<compile_context>
chip_gen: v5e
topology: v5e:2x2
jax: 0.10.0
libtpu: 0.0.40
codegen_flags: <defaults>
</compile_context>

<pallas_src>
import jax
import jax.numpy as jnp
from jax.experimental import pallas as pl
from jax.experimental.pallas import tpu as pltpu


# ----------------------------------------------------------------------------
# In-kernel helpers
# ----------------------------------------------------------------------------
def _recip(x):
    """EUP approx reciprocal + one Newton-Raphson step (~full f32 accuracy)."""
    r = pl.reciprocal(x, approx=True)
    return r * (2.0 - x * r)


def _sigmoid_neg(z):
    """sigmoid(-z) = 0.5 - 0.5*tanh(z/2).

    One EUP push per element (vs exp + reciprocal) and no exp-overflow NaN:
    tanh saturates cleanly to +/-1 for large |z|.
    """
    return 0.5 - 0.5 * jnp.tanh(0.5 * z)


def _calibrator_kernel_rows(x_ref, ab_ref, o_ref):
    """Layout (TB, D): batch rows on sublanes, features on the 128-wide lanes."""
    x = x_ref[...]                       # (TB, D)
    a = ab_ref[0:1, :]                   # (1, D) broadcast over rows
    b = ab_ref[1:2, :]                   # (1, D)
    s = _sigmoid_neg(a * x + b)
    denom = jnp.sum(s, axis=1, keepdims=True)   # XLU lane reduce -> (TB, 1)
    # NOTE: a fully saturated row (denom == 0) yields NaN, matching torch 0/0.
    o_ref[...] = s * _recip(denom)


def _calibrator_kernel_packed(x_ref, ab_ref, bd_ref, o_ref):
    """Packed layout for narrow D (128 % D == 0).

    x is the free, contiguous reshape of (B, D) to (B*D//128, 128): each
    lane-row holds 128//D complete batch rows.  The per-batch-row sum is a
    segmented lane reduction, computed as one matmul against a 128x128
    block-diagonal ones matrix on the otherwise-idle MXU.
    """
    x = x_ref[...]                       # (TR, 128)
    a = ab_ref[0:1, :]                   # (1, 128) -- a tiled 128//D times
    b = ab_ref[1:2, :]
    s = _sigmoid_neg(a * x + b)
    denom = jnp.dot(
        s, bd_ref[...],
        preferred_element_type=jnp.float32,
        precision=jax.lax.Precision.HIGHEST,   # exact f32 segmented sum
    )                                    # (TR, 128): each lane holds its row's sum
    o_ref[...] = s * _recip(denom)


# ----------------------------------------------------------------------------
# Host-side tiling / wrapper
# ----------------------------------------------------------------------------
def _vmem_limit_bytes():
    """Generation-aware scoped-VMEM request (v7x: 64 MiB physical; v5e/v6e: 128)."""
    try:
        cap = int(pltpu.get_tpu_info().vmem_capacity_bytes)
    except Exception:  # pragma: no cover - conservative fallback
        cap = 128 << 20
    return min(64 << 20, max(16 << 20, cap // 2))


def _pick_row_tile(rows, row_bytes, budget_bytes, *, align=8, min_steps=2):
    """Rows per grid step.

    Per-step VMEM ~= double-buffer * (input tile + output tile)
                   = 4 * TR * row_bytes   (params / ones-matrix are tiny, resident).
    Byte-capped (no fixed row cap) so narrow-feature inputs still get
    multi-MiB, lane-dense tiles; clamped so the grid has >= min_steps steps
    when possible (v7x two-TensorCore sharding); never rounded past the
    VMEM budget.
    """
    tr = max(1, budget_bytes // (4 * row_bytes))
    if rows >= min_steps * align:
        tr = min(tr, pl.cdiv(rows, min_steps))
    tr = min(tr, rows)
    if tr < rows:
        tr = max(align, (tr // align) * align)
        while tr > align and 4 * tr * row_bytes > budget_bytes:
            tr -= align
        tr = min(tr, rows)
    return tr


def calibrator_forward(x, a, b):
    """x: (B, D) float32; a, b: (D,) float32. Returns (B, D) float32."""
    B, D = x.shape
    vmem_limit = _vmem_limit_bytes()
    tile_budget = (vmem_limit * 4) // 5          # ~0.8 * limit; ab/bd need only KiBs

    compiler_params = pltpu.CompilerParams(
        dimension_semantics=("parallel",),       # row tiles are independent
        vmem_limit_bytes=vmem_limit,
    )

    if D < 128 and 128 % D == 0 and (B * D) % 128 == 0:
        # Narrow feature dim: pack 128//D batch rows per 128-lane row via a free
        # contiguous reshape (no wrapper transposes => no extra HBM passes).
        G = 128 // D
        rows = (B * D) // 128
        x_p = x.reshape(rows, 128)
        ab = jnp.stack([jnp.tile(a, G), jnp.tile(b, G)], axis=0)      # (2, 128)
        lane_seg = jnp.arange(128) // D
        bd = (lane_seg[:, None] == lane_seg[None, :]).astype(x.dtype)  # (128, 128)
        TR = _pick_row_tile(rows, 128 * 4, tile_budget)
        cost = pl.CostEstimate(
            flops=8 * B * D + 2 * rows * 128 * 128,
            transcendentals=B * D,
            bytes_accessed=(2 * B * D + 2 * 128 + 128 * 128) * 4,
        )
        out = pl.pallas_call(
            _calibrator_kernel_packed,
            out_shape=jax.ShapeDtypeStruct((rows, 128), x.dtype),
            grid_spec=pltpu.PrefetchScalarGridSpec(
                num_scalar_prefetch=0,
                grid=(pl.cdiv(rows, TR),),
                in_specs=[
                    pl.BlockSpec((TR, 128), lambda i: (i, 0)),
                    pl.BlockSpec((2, 128), lambda i: (0, 0)),
                    pl.BlockSpec((128, 128), lambda i: (0, 0)),
                ],
                out_specs=pl.BlockSpec((TR, 128), lambda i: (i, 0)),
            ),
            compiler_params=compiler_params,
            cost_estimate=cost,
        )(x_p, ab, bd)
        return out.reshape(B, D)

    # General path: features on lanes, batch rows tiled over a pipelined grid.
    # (When D % 128 != 0 the feature axis spans the full block: correct, some
    # masked stores, but still no wrapper transposes / extra HBM passes.)
    ab = jnp.stack([a, b], axis=0)               # (2, D) -- single fused param DMA
    TB = _pick_row_tile(B, D * 4, tile_budget)
    cost = pl.CostEstimate(
        flops=8 * B * D,
        transcendentals=B * D,
        bytes_accessed=(2 * B * D + 2 * D) * 4,
    )
    return pl.pallas_call(
        _calibrator_kernel_rows,
        out_shape=jax.ShapeDtypeStruct((B, D), x.dtype),
        grid_spec=pltpu.PrefetchScalarGridSpec(
            num_scalar_prefetch=0,
            grid=(pl.cdiv(B, TB),),
            in_specs=[
                pl.BlockSpec((TB, D), lambda i: (i, 0)),
                pl.BlockSpec((2, D), lambda i: (0, 0)),
            ],
            out_specs=pl.BlockSpec((TB, D), lambda i: (i, 0)),
        ),
        compiler_params=compiler_params,
        cost_estimate=cost,
    )(x, ab)


# ----------------------------------------------------------------------------
# Module init / reference
# ----------------------------------------------------------------------------
def init_calibrator_params(input_size, key):
    """Mirror Calibrator.__init__: identity fc weight (unused in fwd), a,b ~ N(0, 0.1)."""
    ka, kb = jax.random.split(key)
    fc_weight = jnp.eye(input_size, dtype=jnp.float32)  # frozen, unused in forward
    a = 0.1 * jax.random.normal(ka, (input_size,), dtype=jnp.float32)
    b = 0.1 * jax.random.normal(kb, (input_size,), dtype=jnp.float32)
    return fc_weight, a, b


def calibrator_reference(x, a, b):
    z = a[None, :] * x + b[None, :]
    s = jax.nn.sigmoid(-z)
    return s / jnp.sum(s, axis=1, keepdims=True)


# TODO(synk): get_parameters / set_parameters are host-side (byte-string)
# utilities with no kernel equivalent; not implemented here.

if __name__ == "__main__":
    key = jax.random.PRNGKey(0)
    k_x1, k_x2, k_p1, k_p2 = jax.random.split(key, 4)

    # Case 1: narrow feature dim (D < 128, 128 % D == 0) -> packed lane-dense path.
    B1, D1 = 8, 32
    x1 = jax.random.normal(k_x1, (B1, D1), dtype=jnp.float32)
    _, a1, b1 = init_calibrator_params(D1, k_p1)
    out1 = jax.block_until_ready(calibrator_forward(x1, a1, b1))
    ref1 = calibrator_reference(x1, a1, b1)
    assert out1.shape == (B1, D1)
    assert jnp.allclose(out1, ref1, atol=1e-5, rtol=1e-5)

    # Case 2: lane-aligned feature dim (D % 128 == 0) -> row-tiled path, 2-step grid.
    B2, D2 = 16, 256
    x2 = jax.random.normal(k_x2, (B2, D2), dtype=jnp.float32)
    _, a2, b2 = init_calibrator_params(D2, k_p2)
    out2 = jax.block_until_ready(calibrator_forward(x2, a2, b2))
    ref2 = calibrator_reference(x2, a2, b2)
    assert out2.shape == (B2, D2)
    assert jnp.allclose(out2, ref2, atol=1e-5, rtol=1e-5)

    print("KERNEL_OK")
</pallas_src>

<mosaic_0001>
module attributes {stable_mosaic.version = 11 : i64} {
  func.func @_calibrator_kernel_packed(%arg0: i32, %arg1: memref<2x128xf32, #tpu.memory_space<vmem>>, %arg2: memref<2x128xf32, #tpu.memory_space<vmem>>, %arg3: memref<128x128xf32, #tpu.memory_space<vmem>>, %arg4: memref<2x128xf32, #tpu.memory_space<vmem>>) attributes {dimension_semantics = [#tpu.dimension_semantics<parallel>], iteration_bounds = array<i64: 1>, scalar_prefetch = 0 : i64, scratch_operands = 0 : i64, tpu.core_type = #tpu.core_type<tc>, window_params = [{transform_indices = @transform_0, window_bounds = array<i64: 2, 128>}, {pipeline_mode = #tpu.pipeline_mode<synchronous>, transform_indices = @transform_1, window_bounds = array<i64: 2, 128>}, {pipeline_mode = #tpu.pipeline_mode<synchronous>, transform_indices = @transform_2, window_bounds = array<i64: 128, 128>}, {transform_indices = @transform_3, window_bounds = array<i64: 2, 128>}]} {
    %c0 = arith.constant 0 : index
    %c0_0 = arith.constant 0 : index
    %0 = vector.load %arg1[%c0, %c0_0] : memref<2x128xf32, #tpu.memory_space<vmem>>, vector<2x128xf32>
    %c0_1 = arith.constant 0 : index
    %c0_2 = arith.constant 0 : index
    %1 = vector.load %arg2[%c0_1, %c0_2] : memref<2x128xf32, #tpu.memory_space<vmem>>, vector<1x128xf32>
    %c1 = arith.constant 1 : index
    %c0_3 = arith.constant 0 : index
    %2 = vector.load %arg2[%c1, %c0_3] : memref<2x128xf32, #tpu.memory_space<vmem>>, vector<1x128xf32>
    %3 = vector.broadcast %1 : vector<1x128xf32> to vector<2x128xf32>
    %4 = arith.mulf %3, %0 : vector<2x128xf32>
    %5 = vector.broadcast %2 : vector<1x128xf32> to vector<2x128xf32>
    %6 = arith.addf %4, %5 : vector<2x128xf32>
    %cst = arith.constant 5.000000e-01 : f32
    %7 = vector.broadcast %cst : f32 to vector<2x128xf32>
    %8 = arith.mulf %7, %6 : vector<2x128xf32>
    %9 = math.tanh %8 : vector<2x128xf32>
    %cst_4 = arith.constant 5.000000e-01 : f32
    %10 = vector.broadcast %cst_4 : f32 to vector<2x128xf32>
    %11 = arith.mulf %10, %9 : vector<2x128xf32>
    %cst_5 = arith.constant 5.000000e-01 : f32
    %12 = vector.broadcast %cst_5 : f32 to vector<2x128xf32>
    %13 = arith.subf %12, %11 : vector<2x128xf32>
    %c0_6 = arith.constant 0 : index
    %c0_7 = arith.constant 0 : index
    %14 = vector.load %arg3[%c0_6, %c0_7] : memref<128x128xf32, #tpu.memory_space<vmem>>, vector<128x128xf32>
    %cst_8 = arith.constant dense<0.000000e+00> : vector<2x128xf32>
    %15 = tpu.matmul %13, %14, %cst_8 {dimension_numbers = #tpu.dot_dimension_numbers<[1], [0], [0], [1], [0, 0, 1, 1], [], []>, precision = #tpu.contract_precision<fp32>} : vector<2x128xf32>, vector<128x128xf32>, vector<2x128xf32> -> vector<2x128xf32>
    %16 = tpu.reciprocal %15 {approx = true} : vector<2x128xf32> -> vector<2x128xf32>
    %17 = arith.mulf %15, %16 : vector<2x128xf32>
    %cst_9 = arith.constant 2.000000e+00 : f32
    %18 = vector.broadcast %cst_9 : f32 to vector<2x128xf32>
    %19 = arith.subf %18, %17 : vector<2x128xf32>
    %20 = arith.mulf %16, %19 : vector<2x128xf32>
    %21 = arith.mulf %13, %20 : vector<2x128xf32>
    %c0_10 = arith.constant 0 : index
    %c0_11 = arith.constant 0 : index
    %22 = vector.load %arg4[%c0_10, %c0_11] : memref<2x128xf32, #tpu.memory_space<vmem>>, vector<2x128xf32>
    tpu.vector_store %arg4[%c0_10, %c0_11], %21 {strides = array<i32>} : memref<2x128xf32, #tpu.memory_space<vmem>>, vector<2x128xf32>,
    return
  }
  func.func @transform_0(%arg0: i32) -> (i32, i32) {
    %c0_i32 = arith.constant 0 : i32
    %c0_i32_0 = arith.constant 0 : i32
    return %arg0, %c0_i32 : i32, i32
  }
  func.func @transform_1(%arg0: i32) -> (i32, i32) {
    %c0_i32 = arith.constant 0 : i32
    %c0_i32_0 = arith.constant 0 : i32
    %c0_i32_1 = arith.constant 0 : i32
    return %c0_i32, %c0_i32_0 : i32, i32
  }
  func.func @transform_2(%arg0: i32) -> (i32, i32) {
    %c0_i32 = arith.constant 0 : i32
    %c0_i32_0 = arith.constant 0 : i32
    %c0_i32_1 = arith.constant 0 : i32
    return %c0_i32, %c0_i32_0 : i32, i32
  }
  func.func @transform_3(%arg0: i32) -> (i32, i32) {
    %c0_i32 = arith.constant 0 : i32
    %c0_i32_0 = arith.constant 0 : i32
    return %arg0, %c0_i32 : i32, i32
  }
}

</mosaic_0001>

<bundles_post_ra>
// kernel: tpu_custom_call.1
= control target key start
LH: loop header
LB: loop body
LE: loop exit
PB: predicated region body
PF: predicated region fallthrough
CT: control target
= control target key end

     0   :  { %8 = vsyncpa [#allocation3], 0  ;;  %s843_s0 = inlined_call_operand.hbm [shape: f32[2,128], index: 0, kind: input, shape index: {}]   ;;  %s844_s1 = inlined_call_operand.hbm [shape: f32[2,128], index: 1, kind: input, shape index: {}]   ;;  %s845_s2 = inlined_call_operand.hbm [shape: f32[128,128], index: 2, kind: input, shape index: {}]   ;;  %s846_s3 = inlined_call_operand.hbm [shape: f32[2,128], index: 3, kind: output, shape index: {}]  }
   0x1   :  { %9 = vsyncpa [#allocation6], 0  ;;  %s27_s14 = sshll.u32 %s844_s1, 4  ;;  %s28_s14 = int_to_ptr.hbm [resolvable:$true] %s27_s14 }
   0x2   :  { %10 = vsyncpa [#allocation4], 0  ;;  %s564_s15 = smov [#allocation5]   ;;  %s16_s19 = sshll.u32 %s843_s0, 4  ;;  %s17_s19 = int_to_ptr.hbm [resolvable:$true] %s16_s19 }
   0x3   :  { %s29_s16 = sshll.u32 %s564_s15, 4  ;;  %s565_s20 = smov [#allocation2]   ;;  %s30_s16 = int_to_ptr.vmem [resolvable:$true] %s29_s16 }
   0x4   :  { %32 = dma.hbm_to_vmem [thread:$0]  %s28_s14, 32, %s30_s16, [#allocation6]  }
   0x5   :  { %s18_s21 = sshll.u32 %s565_s20, 4  ;;  %s37_s24 = sshll.u32 %s845_s2, 4  ;;  %s19_s21 = int_to_ptr.vmem [resolvable:$true] %s18_s21  ;;  %s38_s24 = int_to_ptr.hbm [resolvable:$true] %s37_s24 }
   0x6   :  { %21 = dma.hbm_to_vmem [thread:$0]  %s17_s19, 32, %s19_s21, [#allocation3]  }
   0x7   :  { %s566_s1 = smov [#allocation7]   ;;  %s567_s26 = smov 128  }
   0x8   :  { %s39_s25 = sshll.u32 %s566_s1, 4  ;;  %s568_s27 = smov 8   ;;  %s40_s25 = int_to_ptr.vmem [resolvable:$true] %s39_s25 }
   0x9   :  { %45 = dma.hbm_to_vmem [thread:$0]  %s38_s24, 2048, %s40_s25, [#allocation6], %s567_s26, %s567_s26, %s568_s27  }
   0xa   :  { %558 = dma.done.wait [#allocation3], 32  }
   0xb   :  { %559 = vsyncadd [#allocation3], 4294967264 }
   0xc   :  { %560 = dma.done.wait [#allocation6], 2080  }
   0xd   :  { %561 = vsyncadd [#allocation6], 4294965216  ;;  %v84_v0 = vld [vmem:[#allocation7 + $0x78] sm:$0xff]  ;;  %v83_v1 = vld [vmem:[#allocation7 + $0x70] sm:$0xff]  ;;  %s569_s0 = smov [#allocation8]   ;;  %s439_s30 = sshll.u32 %s846_s3, 4  ;;  %s440_s30 = int_to_ptr.hbm [resolvable:$true] %s439_s30 }
   0xe   :  { %v82_v2 = vld [vmem:[#allocation7 + $0x68] sm:$0xff]  ;;  %v599_v3 = vand.u32 4294901760, %v84_v0  ;;  %v601_v4 = vand.u32 4294901760, %v83_v1  ;;  %v81_v6 = vld [vmem:[#allocation7 + $0x60] sm:$0xff]  ;;  %v80_v7 = vld [vmem:[#allocation7 + $0x58] sm:$0xff]  ;;  %s437_s2 = sshll.u32 %s569_s0, 4  ;;  %s438_s2 = int_to_ptr.vmem [resolvable:$true] %s437_s2 }
   0xf   :  { %v603_v5 = vand.u32 4294901760, %v82_v2  ;;  %v79_v8 = vld [vmem:[#allocation7 + $0x50] sm:$0xff]  ;;  %v605_v9 = vand.u32 4294901760, %v81_v6  ;;  %v607_v10 = vand.u32 4294901760, %v80_v7  ;;  %v78_v12 = vld [vmem:[#allocation7 + $0x48] sm:$0xff]  ;;  %v77_v13 = vld [vmem:[#allocation7 + $0x40] sm:$0xff] }
  0x10   :  { %v609_v11 = vand.u32 4294901760, %v79_v8  ;;  %86 = vmatpush.msra.mxu0 %v599_v3  ;;  %v613_v14 = vsub.f32 %v84_v0, %v599_v3  ;;  %v616_v15 = vsub.f32 %v83_v1, %v601_v4  ;;  %v621_v17 = vand.u32 4294901760, %v78_v12  ;;  %v76_v18 = vld [vmem:[#allocation7 + $0x38] sm:$0xff]  ;;  %282 = vmatpush.msra.mxu3 %v599_v3  ;;  %v75_v26 = vld [vmem:[#allocation7 + $0x30] sm:$0xff]  ;;  %v74_v36 = vld [vmem:[#allocation7 + $0x28] sm:$0xff] }
  0x11   :  { %v619_v16 = vsub.f32 %v82_v2, %v603_v5  ;;  %v625_v19 = vsub.f32 %v81_v6, %v605_v9  ;;  %v628_v20 = vsub.f32 %v80_v7, %v607_v10  ;;  %v637_v25 = vand.u32 4294901760, %v77_v13  ;;  %v73_v41 = vld [vmem:[#allocation7 + $0x20] sm:$0xff]  ;;  %v72_v47 = vld [vmem:[#allocation7 + $0x18] sm:$0xff]  ;;  %v71_v55 = vld [vmem:[#allocation7 + $0x10] sm:$0xff] }
  0x12   :  { %v631_v21 = vsub.f32 %v79_v8, %v609_v11  ;;  %88 = vmatpush.msra.mxu0 %v601_v4  ;;  %v128_v22 = vand.u32 4294901760, %v613_v14  ;;  %v134_v23 = vand.u32 4294901760, %v616_v15  ;;  %229 = vmatpush.msra.mxu2 %v613_v14  ;;  %v641_v28 = vand.u32 4294901760, %v76_v18  ;;  %v456_v59 = vld [vmem:[#allocation5] ss:$0 sm:$0xff]  ;;  %v70_v61 = vld [vmem:[#allocation7 + $0x8] sm:$0xff] }
  0x13   :  { %v140_v24 = vand.u32 4294901760, %v619_v16  ;;  %v146_v27 = vand.u32 4294901760, %v625_v19  ;;  %v644_v29 = vsub.f32 %v78_v12, %v621_v17  ;;  %284 = vmatpush.msra.mxu3 %v601_v4  ;;  %v152_v33 = vand.u32 4294901760, %v628_v20  ;;  %v58_v62 = vld [vmem:[#allocation2] sm:$0x3]  ;;  %v69_v6 = vld [vmem:[#allocation7] sm:$0xff] }
  0x14   :  { %90 = vmatpush.msra.mxu0 %v603_v5  ;;  %v129_v30 = vsub.f32 %v613_v14, %v128_v22  ;;  %v135_v31 = vsub.f32 %v616_v15, %v134_v23  ;;  %232 = vmatpush.msra.mxu2 %v616_v15  ;;  %v158_v34 = vand.u32 4294901760, %v631_v21  ;;  %v660_v35 = vand.u32 4294901760, %v75_v26  ;;  %v457_v7 = vld [vmem:[#allocation5 + $0x1] ss:$0 sm:$0xff] }
  0x15   :  { %v141_v32 = vsub.f32 %v619_v16, %v140_v24  ;;  %286 = vmatpush.msra.mxu3 %v603_v5  ;;  %v147_v39 = vsub.f32 %v625_v19, %v146_v27  ;;  %v668_v40 = vsub.f32 %v77_v13, %v637_v25  ;;  %v164_v42 = vand.u32 4294901760, %v644_v29 }
  0x16   :  { %v130_v37 = vand.u32 4294901760, %v129_v30  ;;  %92 = vmatpush.msra.mxu0 %v605_v9  ;;  %v136_v38 = vand.u32 4294901760, %v135_v31  ;;  %235 = vmatpush.msra.mxu2 %v619_v16  ;;  %v153_v44 = vsub.f32 %v628_v20, %v152_v33  ;;  %v677_v45 = vand.u32 4294901760, %v74_v36 }
  0x17   :  { %288 = vmatpush.msra.mxu3 %v605_v9  ;;  %v142_v43 = vand.u32 4294901760, %v141_v32  ;;  %v680_v46 = vsub.f32 %v76_v18, %v641_v28  ;;  %v682_v48 = vand.u32 4294901760, %v73_v41  ;;  %v148_v49 = vand.u32 4294901760, %v147_v39 }
  0x18   :  { %131 = vmatpush.msra.mxu1 %v130_v37  ;;  %94 = vmatpush.msra.mxu0 %v607_v10  ;;  %v159_v50 = vsub.f32 %v631_v21, %v158_v34  ;;  %v170_v51 = vand.u32 4294901760, %v668_v40  ;;  %v692_v52 = vsub.f32 %v75_v26, %v660_v35  ;;  %v165_v53 = vsub.f32 %v644_v29, %v164_v42 }
  0x19   :  { %238 = vmatpush.msra.mxu2 %v625_v19  ;;  %290 = vmatpush.msra.mxu3 %v607_v10  ;;  %v697_v54 = vand.u32 4294901760, %v72_v47  ;;  %v154_v56 = vand.u32 4294901760, %v153_v44  ;;  %v176_v57 = vand.u32 4294901760, %v680_v46  ;;  %v704_v58 = vsub.f32 %v74_v36, %v677_v45 }
  0x1a   :  { %137 = vmatpush.msra.mxu1 %v136_v38  ;;  %96 = vmatpush.msra.mxu0 %v609_v11  ;;  %v707_v60 = vsub.f32 %v73_v41, %v682_v48  ;;  %v160_v63 = vand.u32 4294901760, %v159_v50  ;;  %v171_v0 = vsub.f32 %v668_v40, %v170_v51  ;;  %v182_v1 = vand.u32 4294901760, %v692_v52 }
  0x1b   :  { %241 = vmatpush.msra.mxu2 %v628_v20  ;;  %292 = vmatpush.msra.mxu3 %v609_v11  ;;  %v716_v2 = vand.u32 4294901760, %v71_v55  ;;  %v166_v8 = vand.u32 4294901760, %v165_v53  ;;  %v719_v12 = vsub.f32 %v72_v47, %v697_v54  ;;  %v177_v13 = vsub.f32 %v680_v46, %v176_v57 }
  0x1c   :  { %143 = vmatpush.msra.mxu1 %v142_v43  ;;  %98 = vmatpush.msra.mxu0 %v621_v17  ;;  %v188_v18 = vand.u32 4294901760, %v704_v58  ;;  %v728_v26 = vand.u32 4294901760, %v70_v61  ;;  %v62_v30 = vmul.f32 %v456_v59, %v58_v62  ;;  %v194_v31 = vand.u32 4294901760, %v707_v60 }
  0x1d   :  { %244 = vmatpush.msra.mxu2 %v631_v21  ;;  %294 = vmatpush.msra.mxu3 %v621_v17  ;;  %v731_v32 = vand.u32 4294901760, %v69_v6  ;;  %v172_v36 = vand.u32 4294901760, %v171_v0  ;;  %v183_v37 = vsub.f32 %v692_v52, %v182_v1  ;;  %v740_v38 = vsub.f32 %v71_v55, %v716_v2 }
  0x1e   :  { %149 = vmatpush.msra.mxu1 %v148_v49  ;;  %100 = vmatpush.msra.mxu0 %v637_v25  ;;  %v64_v39 = vadd.f32 %v457_v7, %v62_v30  ;;  %v200_v41 = vand.u32 4294901760, %v719_v12  ;;  %v178_v43 = vand.u32 4294901760, %v177_v13  ;;  %v189_v44 = vsub.f32 %v704_v58, %v188_v18 }
  0x1f   :  { %247 = vmatpush.msra.mxu2 %v644_v29  ;;  %296 = vmatpush.msra.mxu3 %v637_v25  ;;  %v750_v47 = vsub.f32 %v70_v61, %v728_v26  ;;  %v195_v50 = vsub.f32 %v707_v60, %v194_v31  ;;  %v184_v53 = vand.u32 4294901760, %v183_v37  ;;  %v206_v55 = vand.u32 4294901760, %v740_v38 }
  0x20   :  { %155 = vmatpush.msra.mxu1 %v154_v56  ;;  %102 = vmatpush.msra.mxu0 %v641_v28  ;;  %v65_v49 = vmul.f32 0.5, %v64_v39  ;;  %v760_v56 = vsub.f32 %v69_v6, %v731_v32  ;;  %v190_v59 = vand.u32 4294901760, %v189_v44  ;;  %v201_v61 = vsub.f32 %v719_v12, %v200_v41 }
  0x21   :  { %250 = vmatpush.msra.mxu2 %v668_v40  ;;  %298 = vmatpush.msra.mxu3 %v641_v28  ;;  %v212_v62 = vand.u32 4294901760, %v750_v47  ;;  %v207_v0 = vsub.f32 %v740_v38, %v206_v55 }
  0x22   :  { %161 = vmatpush.msra.mxu1 %v160_v63  ;;  %104 = vmatpush.msra.mxu0 %v660_v35  ;;  %458 = vtanh.f32 %v65_v49  ;;  %v196_v63 = vand.u32 4294901760, %v195_v50  ;;  %v218_v6 = vand.u32 4294901760, %v760_v56 }
  0x23   :  { %253 = vmatpush.msra.mxu2 %v680_v46  ;;  %300 = vmatpush.msra.mxu3 %v660_v35  ;;  %v213_v13 = vsub.f32 %v750_v47, %v212_v62 }
  0x24   :  { %167 = vmatpush.msra.mxu1 %v166_v8  ;;  %106 = vmatpush.msra.mxu0 %v677_v45  ;;  %v202_v8 = vand.u32 4294901760, %v201_v61  ;;  %v219_v37 = vsub.f32 %v760_v56, %v218_v6 }
  0x25   :  { %256 = vmatpush.msra.mxu2 %v692_v52  ;;  %302 = vmatpush.msra.mxu3 %v677_v45 }
  0x26   :  { %173 = vmatpush.msra.mxu1 %v172_v36  ;;  %108 = vmatpush.msra.mxu0 %v682_v48  ;;  %v208_v36 = vand.u32 4294901760, %v207_v0  ;;  %v220_v49 = vand.u32 4294901760, %v219_v37 }
  0x27   :  { %259 = vmatpush.msra.mxu2 %v704_v58  ;;  %304 = vmatpush.msra.mxu3 %v682_v48 }
  0x28   :  { %179 = vmatpush.msra.mxu1 %v178_v43  ;;  %110 = vmatpush.msra.mxu0 %v697_v54  ;;  %v459_v7 = vpop.eup %458  ;;  %v214_v43 = vand.u32 4294901760, %v213_v13 }
  0x29   :  { %262 = vmatpush.msra.mxu2 %v707_v60  ;;  %306 = vmatpush.msra.mxu3 %v697_v54  ;;  %v67_v30 = vmul.f32 0.5, %v459_v7 }
  0x2a   :  { %185 = vmatpush.msra.mxu1 %v184_v53  ;;  %112 = vmatpush.msra.mxu0 %v716_v2 }
  0x2b   :  { %265 = vmatpush.msra.mxu2 %v719_v12  ;;  %308 = vmatpush.msra.mxu3 %v716_v2  ;;  %v789_v39 = vsub.f32 0.5, %v67_v30 }
  0x2c   :  { %191 = vmatpush.msra.mxu1 %v190_v59  ;;  %114 = vmatpush.msra.mxu0 %v728_v26 }
  0x2d   :  { %268 = vmatpush.msra.mxu2 %v740_v38  ;;  %310 = vmatpush.msra.mxu3 %v728_v26  ;;  %v117_v44 = vand.u32 4294901760, %v789_v39 }
  0x2e   :  { %197 = vmatpush.msra.mxu1 %v196_v63  ;;  %116 = vmatpush.msra.mxu0 %v731_v32 }
  0x2f   :  { %271 = vmatpush.msra.mxu2 %v750_v47  ;;  %312 = vmatpush.msra.mxu3 %v731_v32  ;;  %v118_v14 = vsub.f32 %v789_v39, %v117_v44 }
  0x30   :  { %323 = vmatpush.msrb.mxu0 %v128_v22  ;;  %203 = vmatpush.msra.mxu1 %v202_v8 }
  0x31   :  { %274 = vmatpush.msra.mxu2 %v760_v56  ;;  %v119_v22 = vand.u32 4294901760, %v118_v14 }
  0x32   :  { %327 = vmatpush.msrb.mxu0 %v134_v23  ;;  %209 = vmatpush.msra.mxu1 %v208_v36 }
  0x33   :  { %277 = vmatmul.f32.vlgmr.msra.gmra.mxu2 %v118_v14  ;;  %v120_v15 = vsub.f32 %v118_v14, %v119_v22  ;;  %316 = vmatmul.f32.vlgmr.msra.gmra.mxu3 %v119_v22 }
  0x34   :  { %331 = vmatpush.msrb.mxu0 %v140_v24  ;;  %215 = vmatpush.msra.mxu1 %v214_v43 }
  0x35   :  { %v121_v16 = vand.u32 4294901760, %v120_v15 }
  0x36   :  { %335 = vmatpush.msrb.mxu0 %v146_v27  ;;  %221 = vmatpush.msra.mxu1 %v220_v49 }
  0x37   :  { %223 = vmatmul.f32.vlgmr.msra.gmra.mxu1 %v117_v44  ;;  %122 = vmatmul.f32.vlgmr.msra.gmra.mxu0 %v121_v16 }
  0x38   :  { %390 = vmatpush.msrb.mxu1 %v599_v3  ;;  %339 = vmatpush.msrb.mxu0 %v152_v33 }
  0x3a   :  { %392 = vmatpush.msrb.mxu1 %v601_v4  ;;  %343 = vmatpush.msrb.mxu0 %v158_v34 }
  0x3c   :  { %394 = vmatpush.msrb.mxu1 %v603_v5  ;;  %347 = vmatpush.msrb.mxu0 %v164_v42 }
  0x3e   :  { %396 = vmatpush.msrb.mxu1 %v605_v9  ;;  %351 = vmatpush.msrb.mxu0 %v170_v51 }
  0x40   :  { %398 = vmatpush.msrb.mxu1 %v607_v10  ;;  %355 = vmatpush.msrb.mxu0 %v176_v57 }
  0x42   :  { %400 = vmatpush.msrb.mxu1 %v609_v11  ;;  %359 = vmatpush.msrb.mxu0 %v182_v1 }
  0x44   :  { %402 = vmatpush.msrb.mxu1 %v621_v17  ;;  %363 = vmatpush.msrb.mxu0 %v188_v18 }
  0x46   :  { %404 = vmatpush.msrb.mxu1 %v637_v25  ;;  %367 = vmatpush.msrb.mxu0 %v194_v31 }
  0x48   :  { %406 = vmatpush.msrb.mxu1 %v641_v28  ;;  %371 = vmatpush.msrb.mxu0 %v200_v41 }
  0x4a   :  { %408 = vmatpush.msrb.mxu1 %v660_v35  ;;  %375 = vmatpush.msrb.mxu0 %v206_v55 }
  0x4c   :  { %410 = vmatpush.msrb.mxu1 %v677_v45  ;;  %379 = vmatpush.msrb.mxu0 %v212_v62 }
  0x4e   :  { %412 = vmatpush.msrb.mxu1 %v682_v48  ;;  %383 = vmatpush.msrb.mxu0 %v218_v6 }
  0x4f   :  { %385 = vmatmul.f32.vlgmr.msrb.gmra.mxu0 %v117_v44 }
  0x50   :  { %414 = vmatpush.msrb.mxu1 %v697_v54 }
  0x52   :  { %416 = vmatpush.msrb.mxu1 %v716_v2 }
  0x54   :  { %418 = vmatpush.msrb.mxu1 %v728_v26 }
  0x56   :  { %420 = vmatpush.msrb.mxu1 %v731_v32 }
  0x57   :  { %422 = vmatmul.f32.vlgmr.msrb.gmra.mxu1 %v117_v44 }
  0xb4   :  { %v224_v3 = vpop.f32.mrf.mxu1  ;;  %v123_v4 = vpop.f32.mrf.mxu0 }
  0xb5   :  { %v225_v5 = vadd.f32 %v224_v3, %v123_v4 }
  0xb6   :  { %v278_v9 = vpop.f32.mrf.mxu2  ;;  %v317_v11 = vpop.f32.mrf.mxu3 }
  0xb7   :  { %v279_v10 = vadd.f32 %v278_v9, %v225_v5 }
  0xb9   :  { %v318_v17 = vadd.f32 %v317_v11, %v279_v10 }
  0xcc   :  { %v386_v19 = vpop.f32.mrf.mxu0 }
  0xcd   :  { %v387_v20 = vadd.f32 %v386_v19, %v318_v17 }
  0xd4   :  { %v423_v21 = vpop.f32.mrf.mxu1 }
  0xd5   :  { %v424_v23 = vadd.f32 %v423_v21, %v387_v20 }
  0xd7   :  { %460 = vrcp.f32 %v424_v23 }
  0xdd   :  { %v461_v24 = vpop.eup %460 }
  0xde   :  { %v427_v25 = vmul.f32 %v461_v24, %v424_v23 }
  0xe0   :  { %v428_v27 = vsub.f32 2.0, %v427_v25 }
  0xe2   :  { %v429_v28 = vmul.f32 %v461_v24, %v428_v27 }
  0xe4   :  { %v430_v29 = vmul.f32 %v429_v28, %v789_v39 }
  0xe6   :  { %431 = vst [vmem:[#allocation8] sm:$0x3] %v430_v29 }
  0xe7   :  { %442 = dma.vmem_to_hbm [thread:$0]  %s438_s2, 32, %s440_s30, [#allocation4]  }
  0xe8   :  { %562 = dma.done.wait [#allocation4], 32  }
  0xe9   :  { %563 = vsyncadd [#allocation4], 4294967264 }
  0xea   :  { %447 = vsyncpa [#allocation3], 1 }
  0xeb   :  { %448 = vsyncpa [#allocation6], 1 }
  0xec   :  { %449 = vsyncpa [#allocation4], 1 }

</bundles_post_ra>
